<compile_context>
chip_gen: v5e
topology: v5e:2x2
jax: 0.10.0
libtpu: 0.0.40
codegen_flags: <defaults>
</compile_context>

<pallas_src>
import math

import jax
import jax.numpy as jnp
from jax.experimental import pallas as pl
from jax.experimental.pallas import tpu as pltpu  # noqa: F401  (TPU backend)

# ---------------- model hyper-params (small synthetic config) ---------------
D_MODEL = 32
NHEAD = 4
HEAD_DIM = D_MODEL // NHEAD
DIM_FF = 64
EPS = 1e-5


def _layernorm(x, g, b):
    mu = jnp.mean(x, axis=-1, keepdims=True)
    var = jnp.mean((x - mu) ** 2, axis=-1, keepdims=True)
    return (x - mu) * jax.lax.rsqrt(var + EPS) * g + b


def ca_kernel(src1_ref, src2_ref, pos1_ref, pos2_ref,
              w_ref, w2_ref, p_ref, out_ref):
    B, S1, D = src1_ref.shape
    S2 = src2_ref.shape[1]

    # ---- with_pos_embed + fold batch into the matmul M dimension -----------
    src1 = src1_ref[...].reshape(B * S1, D)
    q_in = (src1_ref[...] + pos1_ref[...]).reshape(B * S1, D)
    k_in = (src2_ref[...] + pos2_ref[...]).reshape(B * S2, D)
    v_in = src2_ref[...].reshape(B * S2, D)

    # ---- unpack fused parameters --------------------------------------------
    w = w_ref[...]                                # (D, 4*D + DIM_FF)
    wq = w[:, 0 * D:1 * D]
    wk = w[:, 1 * D:2 * D]
    wv = w[:, 2 * D:3 * D]
    wo = w[:, 3 * D:4 * D]
    w1 = w[:, 4 * D:4 * D + DIM_FF]
    w2 = w2_ref[...]                              # (DIM_FF, D)
    p = p_ref[...]                                # (10, DIM_FF) packed scalars
    bq, bk, bv, bo = p[0:1, :D], p[1:2, :D], p[2:3, :D], p[3:4, :D]
    g12, be12 = p[4:5, :D], p[5:6, :D]
    b2, g13, be13 = p[6:7, :D], p[7:8, :D], p[8:9, :D]
    b1 = p[9:10, :DIM_FF]

    # ---- Q/K/V in-projections: one matmul each over all B*S rows ------------
    scale = 1.0 / math.sqrt(HEAD_DIM)
    q = (jnp.dot(q_in, wq, preferred_element_type=jnp.float32) + bq) * scale
    k = jnp.dot(k_in, wk, preferred_element_type=jnp.float32) + bk
    v = jnp.dot(v_in, wv, preferred_element_type=jnp.float32) + bv

    q3 = q.reshape(B, S1, D)
    k3 = k.reshape(B, S2, D)
    v3 = v.reshape(B, S2, D)

    # ---- attention: short static head loop, batch as dot batch dim ----------
    head_outs = []
    for h in range(NHEAD):
        lo, hi = h * HEAD_DIM, (h + 1) * HEAD_DIM
        s = jnp.einsum('bqd,bkd->bqk', q3[:, :, lo:hi], k3[:, :, lo:hi],
                       preferred_element_type=jnp.float32)      # (B, S1, S2)
        s = s - jnp.max(s, axis=-1, keepdims=True)
        e = jnp.exp(s)
        inv = pl.reciprocal(jnp.sum(e, axis=-1, keepdims=True), approx=False)
        pr = e * inv
        head_outs.append(
            jnp.einsum('bqk,bkd->bqd', pr, v3[:, :, lo:hi],
                       preferred_element_type=jnp.float32))     # (B, S1, HD)
    attn = jnp.concatenate(head_outs, axis=-1).reshape(B * S1, D)

    # ---- output projection + residual + layernorm (norm12) ------------------
    proj = jnp.dot(attn, wo, preferred_element_type=jnp.float32) + bo
    x = _layernorm(src1 + proj, g12, be12)

    # ---- feed-forward (linear11 -> relu -> linear12) + residual + norm13 ----
    hdn = jnp.maximum(jnp.dot(x, w1, preferred_element_type=jnp.float32) + b1, 0.0)
    y = jnp.dot(hdn, w2, preferred_element_type=jnp.float32) + b2
    out = _layernorm(x + y, g13, be13)

    out_ref[...] = out.reshape(B, S1, D)


@jax.jit
def ca_forward(params, src1, src2, pos_src1=None, pos_src2=None):
    """src1: (S1, B, D), src2: (S2, B, D) — same convention as PyTorch MHA."""
    S1, B, D = src1.shape
    if pos_src1 is None:
        pos_src1 = jnp.zeros_like(src1)
    if pos_src2 is None:
        pos_src2 = jnp.zeros_like(src2)

    # Glue: (S,B,D) -> (B,S,D) so batch can be folded into the matmul M dim.
    src1_b = jnp.transpose(src1, (1, 0, 2))
    src2_b = jnp.transpose(src2, (1, 0, 2))
    pos1_b = jnp.transpose(pos_src1, (1, 0, 2))
    pos2_b = jnp.transpose(pos_src2, (1, 0, 2))

    # Pack 16 tiny parameter tensors into 3 refs (fewer DMA descriptors,
    # wider lane dims).
    w_pack = jnp.concatenate(
        [params["wq"], params["wk"], params["wv"], params["wo"], params["w1"]],
        axis=1)                                               # (D, 4D + FF)

    def pad_ff(a):
        return jnp.pad(a, ((0, 0), (0, DIM_FF - a.shape[1])))

    p_pack = jnp.concatenate(
        [pad_ff(params["bq"]), pad_ff(params["bk"]), pad_ff(params["bv"]),
         pad_ff(params["bo"]), pad_ff(params["g12"]), pad_ff(params["be12"]),
         pad_ff(params["b2"]), pad_ff(params["g13"]), pad_ff(params["be13"]),
         params["b1"]],
        axis=0)                                               # (10, FF)

    out_b = pl.pallas_call(
        ca_kernel,
        out_shape=jax.ShapeDtypeStruct((B, S1, D), jnp.float32),
    )(src1_b, src2_b, pos1_b, pos2_b, w_pack, params["w2"], p_pack)

    return jnp.transpose(out_b, (1, 0, 2))  # back to (S1, B, D)


# ----------------------------- pure-JAX reference ----------------------------
def ca_reference(params, src1, src2, pos_src1=None, pos_src2=None):
    q_in = src1 if pos_src1 is None else src1 + pos_src1
    k_in = src2 if pos_src2 is None else src2 + pos_src2
    S1, B, D = src1.shape
    S2 = src2.shape[0]

    q = jnp.einsum("sbd,de->sbe", q_in, params["wq"]) + params["bq"][0]
    k = jnp.einsum("sbd,de->sbe", k_in, params["wk"]) + params["bk"][0]
    v = jnp.einsum("sbd,de->sbe", src2, params["wv"]) + params["bv"][0]

    q = q.reshape(S1, B, NHEAD, HEAD_DIM) / math.sqrt(HEAD_DIM)
    k = k.reshape(S2, B, NHEAD, HEAD_DIM)
    v = v.reshape(S2, B, NHEAD, HEAD_DIM)
    s = jnp.einsum("qbhd,kbhd->bhqk", q, k)
    p = jax.nn.softmax(s, axis=-1)
    attn = jnp.einsum("bhqk,kbhd->qbhd", p, v).reshape(S1, B, D)
    proj = jnp.einsum("sbd,de->sbe", attn, params["wo"]) + params["bo"][0]

    def ln(x, g, b):
        mu = jnp.mean(x, axis=-1, keepdims=True)
        var = jnp.mean((x - mu) ** 2, axis=-1, keepdims=True)
        return (x - mu) * jax.lax.rsqrt(var + EPS) * g[0] + b[0]

    x = ln(src1 + proj, params["g12"], params["be12"])
    h = jax.nn.relu(jnp.einsum("sbd,df->sbf", x, params["w1"]) + params["b1"][0])
    y = jnp.einsum("sbf,fd->sbd", h, params["w2"]) + params["b2"][0]
    return ln(x + y, params["g13"], params["be13"])


def make_params(key):
    ks = jax.random.split(key, 12)
    s = 0.1
    return {
        "wq": s * jax.random.normal(ks[0], (D_MODEL, D_MODEL), jnp.float32),
        "bq": s * jax.random.normal(ks[1], (1, D_MODEL), jnp.float32),
        "wk": s * jax.random.normal(ks[2], (D_MODEL, D_MODEL), jnp.float32),
        "bk": s * jax.random.normal(ks[3], (1, D_MODEL), jnp.float32),
        "wv": s * jax.random.normal(ks[4], (D_MODEL, D_MODEL), jnp.float32),
        "bv": s * jax.random.normal(ks[5], (1, D_MODEL), jnp.float32),
        "wo": s * jax.random.normal(ks[6], (D_MODEL, D_MODEL), jnp.float32),
        "bo": s * jax.random.normal(ks[7], (1, D_MODEL), jnp.float32),
        "g12": jnp.ones((1, D_MODEL), jnp.float32),
        "be12": jnp.zeros((1, D_MODEL), jnp.float32),
        "w1": s * jax.random.normal(ks[8], (D_MODEL, DIM_FF), jnp.float32),
        "b1": s * jax.random.normal(ks[9], (1, DIM_FF), jnp.float32),
        "w2": s * jax.random.normal(ks[10], (DIM_FF, D_MODEL), jnp.float32),
        "b2": s * jax.random.normal(ks[11], (1, D_MODEL), jnp.float32),
        "g13": jnp.ones((1, D_MODEL), jnp.float32),
        "be13": jnp.zeros((1, D_MODEL), jnp.float32),
    }


if __name__ == "__main__":
    key = jax.random.PRNGKey(0)
    kp, k1, k2, k3, k4 = jax.random.split(key, 5)

    B, S1, S2 = 2, 8, 16
    params = make_params(kp)
    src1 = jax.random.normal(k1, (S1, B, D_MODEL), jnp.float32)
    src2 = jax.random.normal(k2, (S2, B, D_MODEL), jnp.float32)
    pos_src1 = jax.random.normal(k3, (S1, B, D_MODEL), jnp.float32)
    pos_src2 = jax.random.normal(k4, (S2, B, D_MODEL), jnp.float32)

    out = ca_forward(params, src1, src2, pos_src1, pos_src2)
    out = jax.block_until_ready(out)

    ref = ca_reference(params, src1, src2, pos_src1, pos_src2)
    assert out.shape == (S1, B, D_MODEL)
    assert jnp.allclose(out, ref, atol=1e-4, rtol=1e-4), "mismatch vs JAX reference"

    print("KERNEL_OK")
</pallas_src>

<mosaic_0001>
module attributes {stable_mosaic.version = 11 : i64} {
  func.func @ca_kernel(%arg0: memref<2x8x32xf32, #tpu.memory_space<vmem>>, %arg1: memref<2x16x32xf32, #tpu.memory_space<vmem>>, %arg2: memref<2x8x32xf32, #tpu.memory_space<vmem>>, %arg3: memref<2x16x32xf32, #tpu.memory_space<vmem>>, %arg4: memref<32x192xf32, #tpu.memory_space<vmem>>, %arg5: memref<64x32xf32, #tpu.memory_space<vmem>>, %arg6: memref<10x64xf32, #tpu.memory_space<vmem>>, %arg7: memref<2x8x32xf32, #tpu.memory_space<vmem>>) attributes {dimension_semantics = [], scalar_prefetch = 0 : i64, scratch_operands = 0 : i64, tpu.core_type = #tpu.core_type<tc>} {
    %c0 = arith.constant 0 : index
    %c0_0 = arith.constant 0 : index
    %c0_1 = arith.constant 0 : index
    %0 = vector.load %arg0[%c0, %c0_0, %c0_1] : memref<2x8x32xf32, #tpu.memory_space<vmem>>, vector<2x8x32xf32>
    %1 = vector.shape_cast %0 : vector<2x8x32xf32> to vector<16x32xf32>
    %c0_2 = arith.constant 0 : index
    %c0_3 = arith.constant 0 : index
    %c0_4 = arith.constant 0 : index
    %2 = vector.load %arg0[%c0_2, %c0_3, %c0_4] : memref<2x8x32xf32, #tpu.memory_space<vmem>>, vector<2x8x32xf32>
    %c0_5 = arith.constant 0 : index
    %c0_6 = arith.constant 0 : index
    %c0_7 = arith.constant 0 : index
    %3 = vector.load %arg2[%c0_5, %c0_6, %c0_7] : memref<2x8x32xf32, #tpu.memory_space<vmem>>, vector<2x8x32xf32>
    %4 = arith.addf %2, %3 : vector<2x8x32xf32>
    %5 = vector.shape_cast %4 : vector<2x8x32xf32> to vector<16x32xf32>
    %c0_8 = arith.constant 0 : index
    %c0_9 = arith.constant 0 : index
    %c0_10 = arith.constant 0 : index
    %6 = vector.load %arg1[%c0_8, %c0_9, %c0_10] : memref<2x16x32xf32, #tpu.memory_space<vmem>>, vector<2x16x32xf32>
    %c0_11 = arith.constant 0 : index
    %c0_12 = arith.constant 0 : index
    %c0_13 = arith.constant 0 : index
    %7 = vector.load %arg3[%c0_11, %c0_12, %c0_13] : memref<2x16x32xf32, #tpu.memory_space<vmem>>, vector<2x16x32xf32>
    %8 = arith.addf %6, %7 : vector<2x16x32xf32>
    %9 = vector.shape_cast %8 : vector<2x16x32xf32> to vector<32x32xf32>
    %c0_14 = arith.constant 0 : index
    %c0_15 = arith.constant 0 : index
    %c0_16 = arith.constant 0 : index
    %10 = vector.load %arg1[%c0_14, %c0_15, %c0_16] : memref<2x16x32xf32, #tpu.memory_space<vmem>>, vector<2x16x32xf32>
    %11 = vector.shape_cast %10 : vector<2x16x32xf32> to vector<32x32xf32>
    %c0_17 = arith.constant 0 : index
    %c0_18 = arith.constant 0 : index
    %12 = vector.load %arg4[%c0_17, %c0_18] : memref<32x192xf32, #tpu.memory_space<vmem>>, vector<32x192xf32>
    %13 = vector.extract_strided_slice %12 {offsets = [0, 0], sizes = [32, 32], strides = [1, 1]} : vector<32x192xf32> to vector<32x32xf32>
    %14 = vector.extract_strided_slice %12 {offsets = [0, 32], sizes = [32, 32], strides = [1, 1]} : vector<32x192xf32> to vector<32x32xf32>
    %15 = vector.extract_strided_slice %12 {offsets = [0, 64], sizes = [32, 32], strides = [1, 1]} : vector<32x192xf32> to vector<32x32xf32>
    %16 = vector.extract_strided_slice %12 {offsets = [0, 96], sizes = [32, 32], strides = [1, 1]} : vector<32x192xf32> to vector<32x32xf32>
    %17 = vector.extract_strided_slice %12 {offsets = [0, 128], sizes = [32, 64], strides = [1, 1]} : vector<32x192xf32> to vector<32x64xf32>
    %c0_19 = arith.constant 0 : index
    %c0_20 = arith.constant 0 : index
    %18 = vector.load %arg5[%c0_19, %c0_20] : memref<64x32xf32, #tpu.memory_space<vmem>>, vector<64x32xf32>
    %c0_21 = arith.constant 0 : index
    %c0_22 = arith.constant 0 : index
    %19 = vector.load %arg6[%c0_21, %c0_22] : memref<10x64xf32, #tpu.memory_space<vmem>>, vector<10x64xf32>
    %20 = vector.extract_strided_slice %19 {offsets = [0, 0], sizes = [1, 32], strides = [1, 1]} : vector<10x64xf32> to vector<1x32xf32>
    %21 = vector.extract_strided_slice %19 {offsets = [1, 0], sizes = [1, 32], strides = [1, 1]} : vector<10x64xf32> to vector<1x32xf32>
    %22 = vector.extract_strided_slice %19 {offsets = [2, 0], sizes = [1, 32], strides = [1, 1]} : vector<10x64xf32> to vector<1x32xf32>
    %23 = vector.extract_strided_slice %19 {offsets = [3, 0], sizes = [1, 32], strides = [1, 1]} : vector<10x64xf32> to vector<1x32xf32>
    %24 = vector.extract_strided_slice %19 {offsets = [4, 0], sizes = [1, 32], strides = [1, 1]} : vector<10x64xf32> to vector<1x32xf32>
    %25 = vector.extract_strided_slice %19 {offsets = [5, 0], sizes = [1, 32], strides = [1, 1]} : vector<10x64xf32> to vector<1x32xf32>
    %26 = vector.extract_strided_slice %19 {offsets = [6, 0], sizes = [1, 32], strides = [1, 1]} : vector<10x64xf32> to vector<1x32xf32>
    %27 = vector.extract_strided_slice %19 {offsets = [7, 0], sizes = [1, 32], strides = [1, 1]} : vector<10x64xf32> to vector<1x32xf32>
    %28 = vector.extract_strided_slice %19 {offsets = [8, 0], sizes = [1, 32], strides = [1, 1]} : vector<10x64xf32> to vector<1x32xf32>
    %29 = vector.extract_strided_slice %19 {offsets = [9, 0], sizes = [1, 64], strides = [1, 1]} : vector<10x64xf32> to vector<1x64xf32>
    %cst = arith.constant dense<0.000000e+00> : vector<16x32xf32>
    %30 = tpu.matmul %5, %13, %cst {dimension_numbers = #tpu.dot_dimension_numbers<[1], [0], [0], [1], [0, 0, 1, 1], [], []>} : vector<16x32xf32>, vector<32x32xf32>, vector<16x32xf32> -> vector<16x32xf32>
    %31 = vector.broadcast %20 : vector<1x32xf32> to vector<16x32xf32>
    %32 = arith.addf %30, %31 : vector<16x32xf32>
    %cst_23 = arith.constant 0.353553385 : f32
    %33 = vector.broadcast %cst_23 : f32 to vector<16x32xf32>
    %34 = arith.mulf %32, %33 : vector<16x32xf32>
    %cst_24 = arith.constant dense<0.000000e+00> : vector<32x32xf32>
    %35 = tpu.matmul %9, %14, %cst_24 {dimension_numbers = #tpu.dot_dimension_numbers<[1], [0], [0], [1], [0, 0, 1, 1], [], []>} : vector<32x32xf32>, vector<32x32xf32>, vector<32x32xf32> -> vector<32x32xf32>
    %36 = vector.broadcast %21 : vector<1x32xf32> to vector<32x32xf32>
    %37 = arith.addf %35, %36 : vector<32x32xf32>
    %cst_25 = arith.constant dense<0.000000e+00> : vector<32x32xf32>
    %38 = tpu.matmul %11, %15, %cst_25 {dimension_numbers = #tpu.dot_dimension_numbers<[1], [0], [0], [1], [0, 0, 1, 1], [], []>} : vector<32x32xf32>, vector<32x32xf32>, vector<32x32xf32> -> vector<32x32xf32>
    %39 = vector.broadcast %22 : vector<1x32xf32> to vector<32x32xf32>
    %40 = arith.addf %38, %39 : vector<32x32xf32>
    %41 = vector.shape_cast %34 : vector<16x32xf32> to vector<2x8x32xf32>
    %42 = vector.shape_cast %37 : vector<32x32xf32> to vector<2x16x32xf32>
    %43 = vector.shape_cast %40 : vector<32x32xf32> to vector<2x16x32xf32>
    %44 = vector.extract_strided_slice %41 {offsets = [0, 0, 0], sizes = [2, 8, 8], strides = [1, 1, 1]} : vector<2x8x32xf32> to vector<2x8x8xf32>
    %45 = vector.extract_strided_slice %42 {offsets = [0, 0, 0], sizes = [2, 16, 8], strides = [1, 1, 1]} : vector<2x16x32xf32> to vector<2x16x8xf32>
    "tpu.trace_start"() <{level = 10 : i32, message = "bqd,bkd->bqk"}> : () -> ()
    %cst_26 = arith.constant dense<0.000000e+00> : vector<2x8x16xf32>
    %46 = tpu.matmul %44, %45, %cst_26 {dimension_numbers = #tpu.dot_dimension_numbers<[2], [2], [1], [1], [0, 0, 0, 1, 1, 1], [0], [0]>} : vector<2x8x8xf32>, vector<2x16x8xf32>, vector<2x8x16xf32> -> vector<2x8x16xf32>
    "tpu.trace_stop"() : () -> ()
    %cst_27 = arith.constant dense<0xFF800000> : vector<2x8xf32>
    %47 = vector.multi_reduction <maximumf>, %46, %cst_27 [2] : vector<2x8x16xf32> to vector<2x8xf32>
    %48 = vector.shape_cast %47 : vector<2x8xf32> to vector<2x8x1xf32>
    %49 = vector.broadcast %48 : vector<2x8x1xf32> to vector<2x8x16xf32>
    %50 = arith.subf %46, %49 : vector<2x8x16xf32>
    %51 = math.exp %50 : vector<2x8x16xf32>
    %cst_28 = arith.constant dense<0.000000e+00> : vector<2x8xf32>
    %52 = vector.multi_reduction <add>, %51, %cst_28 [2] : vector<2x8x16xf32> to vector<2x8xf32>
    %53 = vector.shape_cast %52 : vector<2x8xf32> to vector<2x8x1xf32>
    %54 = tpu.reciprocal %53 : vector<2x8x1xf32> -> vector<2x8x1xf32>
    %55 = vector.broadcast %54 : vector<2x8x1xf32> to vector<2x8x16xf32>
    %56 = arith.mulf %51, %55 : vector<2x8x16xf32>
    %57 = vector.extract_strided_slice %43 {offsets = [0, 0, 0], sizes = [2, 16, 8], strides = [1, 1, 1]} : vector<2x16x32xf32> to vector<2x16x8xf32>
    "tpu.trace_start"() <{level = 10 : i32, message = "bqk,bkd->bqd"}> : () -> ()
    %cst_29 = arith.constant dense<0.000000e+00> : vector<2x8x8xf32>
    %58 = tpu.matmul %56, %57, %cst_29 {dimension_numbers = #tpu.dot_dimension_numbers<[2], [1], [1], [2], [0, 0, 0, 1, 1, 2], [0], [0]>} : vector<2x8x16xf32>, vector<2x16x8xf32>, vector<2x8x8xf32> -> vector<2x8x8xf32>
    "tpu.trace_stop"() : () -> ()
    %59 = vector.extract_strided_slice %41 {offsets = [0, 0, 8], sizes = [2, 8, 8], strides = [1, 1, 1]} : vector<2x8x32xf32> to vector<2x8x8xf32>
    %60 = vector.extract_strided_slice %42 {offsets = [0, 0, 8], sizes = [2, 16, 8], strides = [1, 1, 1]} : vector<2x16x32xf32> to vector<2x16x8xf32>
    "tpu.trace_start"() <{level = 10 : i32, message = "bqd,bkd->bqk"}> : () -> ()
    %cst_30 = arith.constant dense<0.000000e+00> : vector<2x8x16xf32>
    %61 = tpu.matmul %59, %60, %cst_30 {dimension_numbers = #tpu.dot_dimension_numbers<[2], [2], [1], [1], [0, 0, 0, 1, 1, 1], [0], [0]>} : vector<2x8x8xf32>, vector<2x16x8xf32>, vector<2x8x16xf32> -> vector<2x8x16xf32>
    "tpu.trace_stop"() : () -> ()
    %cst_31 = arith.constant dense<0xFF800000> : vector<2x8xf32>
    %62 = vector.multi_reduction <maximumf>, %61, %cst_31 [2] : vector<2x8x16xf32> to vector<2x8xf32>
    %63 = vector.shape_cast %62 : vector<2x8xf32> to vector<2x8x1xf32>
    %64 = vector.broadcast %63 : vector<2x8x1xf32> to vector<2x8x16xf32>
    %65 = arith.subf %61, %64 : vector<2x8x16xf32>
    %66 = math.exp %65 : vector<2x8x16xf32>
    %cst_32 = arith.constant dense<0.000000e+00> : vector<2x8xf32>
    %67 = vector.multi_reduction <add>, %66, %cst_32 [2] : vector<2x8x16xf32> to vector<2x8xf32>
    %68 = vector.shape_cast %67 : vector<2x8xf32> to vector<2x8x1xf32>
    %69 = tpu.reciprocal %68 : vector<2x8x1xf32> -> vector<2x8x1xf32>
    %70 = vector.broadcast %69 : vector<2x8x1xf32> to vector<2x8x16xf32>
    %71 = arith.mulf %66, %70 : vector<2x8x16xf32>
    %72 = vector.extract_strided_slice %43 {offsets = [0, 0, 8], sizes = [2, 16, 8], strides = [1, 1, 1]} : vector<2x16x32xf32> to vector<2x16x8xf32>
    "tpu.trace_start"() <{level = 10 : i32, message = "bqk,bkd->bqd"}> : () -> ()
    %cst_33 = arith.constant dense<0.000000e+00> : vector<2x8x8xf32>
    %73 = tpu.matmul %71, %72, %cst_33 {dimension_numbers = #tpu.dot_dimension_numbers<[2], [1], [1], [2], [0, 0, 0, 1, 1, 2], [0], [0]>} : vector<2x8x16xf32>, vector<2x16x8xf32>, vector<2x8x8xf32> -> vector<2x8x8xf32>
    "tpu.trace_stop"() : () -> ()
    %74 = vector.extract_strided_slice %41 {offsets = [0, 0, 16], sizes = [2, 8, 8], strides = [1, 1, 1]} : vector<2x8x32xf32> to vector<2x8x8xf32>
    %75 = vector.extract_strided_slice %42 {offsets = [0, 0, 16], sizes = [2, 16, 8], strides = [1, 1, 1]} : vector<2x16x32xf32> to vector<2x16x8xf32>
    "tpu.trace_start"() <{level = 10 : i32, message = "bqd,bkd->bqk"}> : () -> ()
    %cst_34 = arith.constant dense<0.000000e+00> : vector<2x8x16xf32>
    %76 = tpu.matmul %74, %75, %cst_34 {dimension_numbers = #tpu.dot_dimension_numbers<[2], [2], [1], [1], [0, 0, 0, 1, 1, 1], [0], [0]>} : vector<2x8x8xf32>, vector<2x16x8xf32>, vector<2x8x16xf32> -> vector<2x8x16xf32>
    "tpu.trace_stop"() : () -> ()
    %cst_35 = arith.constant dense<0xFF800000> : vector<2x8xf32>
    %77 = vector.multi_reduction <maximumf>, %76, %cst_35 [2] : vector<2x8x16xf32> to vector<2x8xf32>
    %78 = vector.shape_cast %77 : vector<2x8xf32> to vector<2x8x1xf32>
    %79 = vector.broadcast %78 : vector<2x8x1xf32> to vector<2x8x16xf32>
    %80 = arith.subf %76, %79 : vector<2x8x16xf32>
    %81 = math.exp %80 : vector<2x8x16xf32>
    %cst_36 = arith.constant dense<0.000000e+00> : vector<2x8xf32>
    %82 = vector.multi_reduction <add>, %81, %cst_36 [2] : vector<2x8x16xf32> to vector<2x8xf32>
    %83 = vector.shape_cast %82 : vector<2x8xf32> to vector<2x8x1xf32>
    %84 = tpu.reciprocal %83 : vector<2x8x1xf32> -> vector<2x8x1xf32>
    %85 = vector.broadcast %84 : vector<2x8x1xf32> to vector<2x8x16xf32>
    %86 = arith.mulf %81, %85 : vector<2x8x16xf32>
    %87 = vector.extract_strided_slice %43 {offsets = [0, 0, 16], sizes = [2, 16, 8], strides = [1, 1, 1]} : vector<2x16x32xf32> to vector<2x16x8xf32>
    "tpu.trace_start"() <{level = 10 : i32, message = "bqk,bkd->bqd"}> : () -> ()
    %cst_37 = arith.constant dense<0.000000e+00> : vector<2x8x8xf32>
    %88 = tpu.matmul %86, %87, %cst_37 {dimension_numbers = #tpu.dot_dimension_numbers<[2], [1], [1], [2], [0, 0, 0, 1, 1, 2], [0], [0]>} : vector<2x8x16xf32>, vector<2x16x8xf32>, vector<2x8x8xf32> -> vector<2x8x8xf32>
    "tpu.trace_stop"() : () -> ()
    %89 = vector.extract_strided_slice %41 {offsets = [0, 0, 24], sizes = [2, 8, 8], strides = [1, 1, 1]} : vector<2x8x32xf32> to vector<2x8x8xf32>
    %90 = vector.extract_strided_slice %42 {offsets = [0, 0, 24], sizes = [2, 16, 8], strides = [1, 1, 1]} : vector<2x16x32xf32> to vector<2x16x8xf32>
    "tpu.trace_start"() <{level = 10 : i32, message = "bqd,bkd->bqk"}> : () -> ()
    %cst_38 = arith.constant dense<0.000000e+00> : vector<2x8x16xf32>
    %91 = tpu.matmul %89, %90, %cst_38 {dimension_numbers = #tpu.dot_dimension_numbers<[2], [2], [1], [1], [0, 0, 0, 1, 1, 1], [0], [0]>} : vector<2x8x8xf32>, vector<2x16x8xf32>, vector<2x8x16xf32> -> vector<2x8x16xf32>
    "tpu.trace_stop"() : () -> ()
    %cst_39 = arith.constant dense<0xFF800000> : vector<2x8xf32>
    %92 = vector.multi_reduction <maximumf>, %91, %cst_39 [2] : vector<2x8x16xf32> to vector<2x8xf32>
    %93 = vector.shape_cast %92 : vector<2x8xf32> to vector<2x8x1xf32>
    %94 = vector.broadcast %93 : vector<2x8x1xf32> to vector<2x8x16xf32>
    %95 = arith.subf %91, %94 : vector<2x8x16xf32>
    %96 = math.exp %95 : vector<2x8x16xf32>
    %cst_40 = arith.constant dense<0.000000e+00> : vector<2x8xf32>
    %97 = vector.multi_reduction <add>, %96, %cst_40 [2] : vector<2x8x16xf32> to vector<2x8xf32>
    %98 = vector.shape_cast %97 : vector<2x8xf32> to vector<2x8x1xf32>
    %99 = tpu.reciprocal %98 : vector<2x8x1xf32> -> vector<2x8x1xf32>
    %100 = vector.broadcast %99 : vector<2x8x1xf32> to vector<2x8x16xf32>
    %101 = arith.mulf %96, %100 : vector<2x8x16xf32>
    %102 = vector.extract_strided_slice %43 {offsets = [0, 0, 24], sizes = [2, 16, 8], strides = [1, 1, 1]} : vector<2x16x32xf32> to vector<2x16x8xf32>
    "tpu.trace_start"() <{level = 10 : i32, message = "bqk,bkd->bqd"}> : () -> ()
    %cst_41 = arith.constant dense<0.000000e+00> : vector<2x8x8xf32>
    %103 = tpu.matmul %101, %102, %cst_41 {dimension_numbers = #tpu.dot_dimension_numbers<[2], [1], [1], [2], [0, 0, 0, 1, 1, 2], [0], [0]>} : vector<2x8x16xf32>, vector<2x16x8xf32>, vector<2x8x8xf32> -> vector<2x8x8xf32>
    "tpu.trace_stop"() : () -> ()
    %104 = tpu.concatenate %58, %73, %88, %103 in 2 : vector<2x8x8xf32>, vector<2x8x8xf32>, vector<2x8x8xf32>, vector<2x8x8xf32> -> vector<2x8x32xf32>
    %105 = vector.shape_cast %104 : vector<2x8x32xf32> to vector<16x32xf32>
    %cst_42 = arith.constant dense<0.000000e+00> : vector<16x32xf32>
    %106 = tpu.matmul %105, %16, %cst_42 {dimension_numbers = #tpu.dot_dimension_numbers<[1], [0], [0], [1], [0, 0, 1, 1], [], []>} : vector<16x32xf32>, vector<32x32xf32>, vector<16x32xf32> -> vector<16x32xf32>
    %107 = vector.broadcast %23 : vector<1x32xf32> to vector<16x32xf32>
    %108 = arith.addf %106, %107 : vector<16x32xf32>
    %109 = arith.addf %1, %108 : vector<16x32xf32>
    %cst_43 = arith.constant dense<0.000000e+00> : vector<16xf32>
    %110 = vector.multi_reduction <add>, %109, %cst_43 [1] : vector<16x32xf32> to vector<16xf32>
    %111 = vector.shape_cast %110 : vector<16xf32> to vector<16x1xf32>
    %cst_44 = arith.constant 3.200000e+01 : f32
    %112 = vector.broadcast %cst_44 : f32 to vector<16x1xf32>
    %113 = arith.divf %111, %112 : vector<16x1xf32>
    %114 = vector.broadcast %113 : vector<16x1xf32> to vector<16x32xf32>
    %115 = arith.subf %109, %114 : vector<16x32xf32>
    %116 = arith.mulf %115, %115 : vector<16x32xf32>
    %cst_45 = arith.constant dense<0.000000e+00> : vector<16xf32>
    %117 = vector.multi_reduction <add>, %116, %cst_45 [1] : vector<16x32xf32> to vector<16xf32>
    %118 = vector.shape_cast %117 : vector<16xf32> to vector<16x1xf32>
    %cst_46 = arith.constant 3.200000e+01 : f32
    %119 = vector.broadcast %cst_46 : f32 to vector<16x1xf32>
    %120 = arith.divf %118, %119 : vector<16x1xf32>
    %121 = vector.broadcast %113 : vector<16x1xf32> to vector<16x32xf32>
    %122 = arith.subf %109, %121 : vector<16x32xf32>
    %cst_47 = arith.constant 9.99999974E-6 : f32
    %123 = vector.broadcast %cst_47 : f32 to vector<16x1xf32>
    %124 = arith.addf %120, %123 : vector<16x1xf32>
    %125 = math.rsqrt %124 : vector<16x1xf32>
    %126 = vector.broadcast %125 : vector<16x1xf32> to vector<16x32xf32>
    %127 = arith.mulf %122, %126 : vector<16x32xf32>
    %128 = vector.broadcast %24 : vector<1x32xf32> to vector<16x32xf32>
    %129 = arith.mulf %127, %128 : vector<16x32xf32>
    %130 = vector.broadcast %25 : vector<1x32xf32> to vector<16x32xf32>
    %131 = arith.addf %129, %130 : vector<16x32xf32>
    %cst_48 = arith.constant dense<0.000000e+00> : vector<16x64xf32>
    %132 = tpu.matmul %131, %17, %cst_48 {dimension_numbers = #tpu.dot_dimension_numbers<[1], [0], [0], [1], [0, 0, 1, 1], [], []>} : vector<16x32xf32>, vector<32x64xf32>, vector<16x64xf32> -> vector<16x64xf32>
    %133 = vector.broadcast %29 : vector<1x64xf32> to vector<16x64xf32>
    %134 = arith.addf %132, %133 : vector<16x64xf32>
    %cst_49 = arith.constant 0.000000e+00 : f32
    %135 = vector.broadcast %cst_49 : f32 to vector<16x64xf32>
    %136 = arith.maximumf %134, %135 : vector<16x64xf32>
    %cst_50 = arith.constant dense<0.000000e+00> : vector<16x32xf32>
    %137 = tpu.matmul %136, %18, %cst_50 {dimension_numbers = #tpu.dot_dimension_numbers<[1], [0], [0], [1], [0, 0, 1, 1], [], []>} : vector<16x64xf32>, vector<64x32xf32>, vector<16x32xf32> -> vector<16x32xf32>
    %138 = vector.broadcast %26 : vector<1x32xf32> to vector<16x32xf32>
    %139 = arith.addf %137, %138 : vector<16x32xf32>
    %140 = arith.addf %131, %139 : vector<16x32xf32>
    %cst_51 = arith.constant dense<0.000000e+00> : vector<16xf32>
    %141 = vector.multi_reduction <add>, %140, %cst_51 [1] : vector<16x32xf32> to vector<16xf32>
    %142 = vector.shape_cast %141 : vector<16xf32> to vector<16x1xf32>
    %cst_52 = arith.constant 3.200000e+01 : f32
    %143 = vector.broadcast %cst_52 : f32 to vector<16x1xf32>
    %144 = arith.divf %142, %143 : vector<16x1xf32>
    %145 = vector.broadcast %144 : vector<16x1xf32> to vector<16x32xf32>
    %146 = arith.subf %140, %145 : vector<16x32xf32>
    %147 = arith.mulf %146, %146 : vector<16x32xf32>
    %cst_53 = arith.constant dense<0.000000e+00> : vector<16xf32>
    %148 = vector.multi_reduction <add>, %147, %cst_53 [1] : vector<16x32xf32> to vector<16xf32>
    %149 = vector.shape_cast %148 : vector<16xf32> to vector<16x1xf32>
    %cst_54 = arith.constant 3.200000e+01 : f32
    %150 = vector.broadcast %cst_54 : f32 to vector<16x1xf32>
    %151 = arith.divf %149, %150 : vector<16x1xf32>
    %152 = vector.broadcast %144 : vector<16x1xf32> to vector<16x32xf32>
    %153 = arith.subf %140, %152 : vector<16x32xf32>
    %cst_55 = arith.constant 9.99999974E-6 : f32
    %154 = vector.broadcast %cst_55 : f32 to vector<16x1xf32>
    %155 = arith.addf %151, %154 : vector<16x1xf32>
    %156 = math.rsqrt %155 : vector<16x1xf32>
    %157 = vector.broadcast %156 : vector<16x1xf32> to vector<16x32xf32>
    %158 = arith.mulf %153, %157 : vector<16x32xf32>
    %159 = vector.broadcast %27 : vector<1x32xf32> to vector<16x32xf32>
    %160 = arith.mulf %158, %159 : vector<16x32xf32>
    %161 = vector.broadcast %28 : vector<1x32xf32> to vector<16x32xf32>
    %162 = arith.addf %160, %161 : vector<16x32xf32>
    %163 = vector.shape_cast %162 : vector<16x32xf32> to vector<2x8x32xf32>
    %c0_56 = arith.constant 0 : index
    %c0_57 = arith.constant 0 : index
    %c0_58 = arith.constant 0 : index
    %164 = vector.load %arg7[%c0_56, %c0_57, %c0_58] : memref<2x8x32xf32, #tpu.memory_space<vmem>>, vector<2x8x32xf32>
    tpu.vector_store %arg7[%c0_56, %c0_57, %c0_58], %163 {strides = array<i32>} : memref<2x8x32xf32, #tpu.memory_space<vmem>>, vector<2x8x32xf32>,
    return
  }
}

</mosaic_0001>

<bundles_post_ra>
// kernel: ca_forward.1
= control target key start
LH: loop header
LB: loop body
LE: loop exit
PB: predicated region body
PF: predicated region fallthrough
CT: control target
= control target key end

     0   :  { %s1289_s9 = smov 96   ;;  %s1290_s10 = smov 64   ;;  %vm63_vm0 = vcmask 261120   ;;  %vm207_vm1 = vcmask 64512   ;;  %vm266_vm2 = vcmask 130048   ;;  %s1654_s4 = inlined_call_operand.vmem [shape: f32[32,192], index: 4, kind: input, shape index: {}]   ;;  %s1655_s0 = inlined_call_operand.vmem [shape: f32[2,8,32], index: 0, kind: input, shape index: {}]   ;;  %s1656_s2 = inlined_call_operand.vmem [shape: f32[2,8,32], index: 2, kind: input, shape index: {}]   ;;  %s1657_s1 = inlined_call_operand.vmem [shape: f32[2,16,32], index: 1, kind: input, shape index: {}]   ;;  %s1658_s3 = inlined_call_operand.vmem [shape: f32[2,16,32], index: 3, kind: input, shape index: {}]   ;;  %s1659_s6 = inlined_call_operand.vmem [shape: f32[10,64], index: 6, kind: input, shape index: {}]   ;;  %s1660_s5 = inlined_call_operand.vmem [shape: f32[64,32], index: 5, kind: input, shape index: {}]   ;;  %s1661_s7 = inlined_call_operand.vmem [shape: f32[2,8,32], index: 7, kind: output, shape index: {}]  }
   0x1   :  { %v48_v0 = vld [vmem:[%s1654_s4 + $0x20] sm:$0xff]  ;;  %v50_v1 = vld [vmem:[%s1654_s4 + $0x30] sm:$0xff]  ;;  %v1372_v9 = vld [vmem:[%s1655_s0 + $0x8] sm:$0xff]  ;;  %s1291_s27 = smov 120   ;;  %s1295_s14 = smov 8  }
   0x2   :  { %v1345_v2 = vpack.i.bf16 %v48_v0, %v50_v1  ;;  %82 = vmatpush.msra.mxu1 %v50_v1  ;;  %v1350_v3 = vld [vmem:[%s1655_s0] sm:$0xff]  ;;  %v46_v6 = vld [vmem:[%s1654_s4 + $0x10] sm:$0xff]  ;;  %v29_v10 = vld [vmem:[%s1656_s2 + $0x8] sm:$0xff]  ;;  %s1296_s15 = smov 16   ;;  %s1297_s16 = smov 24  }
   0x3   :  { %v28_v4 = vld [vmem:[%s1656_s2] sm:$0xff]  ;;  %v31_v11 = vadd.f32 %v29_v10, %v1372_v9  ;;  %v33_v27 = vld [vmem:[%s1657_s1 + $0x8] sm:$0xff]  ;;  %v34_v35 = vld [vmem:[%s1657_s1 + $0x10] sm:$0xff] }
   0x4   :  { %1187 = vrot.lane.b32.xlu0 %v1345_v2, %s1289_s9  ;;  %1197 = vrot.lane.b32.xlu1 %v1345_v2, %s1290_s10  ;;  %v44_v5 = vld [vmem:[%s1654_s4] sm:$0xff]  ;;  %v30_v7 = vadd.f32 %v28_v4, %v1350_v3  ;;  %v37_v28 = vld [vmem:[%s1658_s3 + $0x8] sm:$0xff] }
   0x5   :  { %83 = vmatpush.msra.mxu1 %v48_v0  ;;  %v1364_v8 = vpack.i.bf16 %v44_v5, %v46_v6  ;;  %v32_v16 = vld [vmem:[%s1657_s1] sm:$0xff]  ;;  %v41_v32 = vadd.f32 %v37_v28, %v33_v27  ;;  %v38_v36 = vld [vmem:[%s1658_s3 + $0x10] sm:$0xff]  ;;  %v35_v38 = vld [vmem:[%s1657_s1 + $0x18] sm:$0xff]  ;;  %s1293_s1 = smov 104  }
   0x6   :  { %v36_v17 = vld [vmem:[%s1658_s3] sm:$0xff]  ;;  %v42_v37 = vadd.f32 %v38_v36, %v34_v35  ;;  %v39_v39 = vld [vmem:[%s1658_s3 + $0x18] sm:$0xff]  ;;  %s1294_s3 = smov 32  }
   0x7   :  { %84 = vmatpush.msra.mxu1 %v46_v6  ;;  %v40_v22 = vadd.f32 %v36_v17, %v32_v16  ;;  %v1388_v24 = vld [vmem:[%s1659_s6] sm:$0xff]  ;;  %v43_v40 = vadd.f32 %v39_v39, %v35_v38 }
   0x8   :  { %v62_v26 = vperm.slane %v1388_v24, 0  ;;  %v95_v45 = vperm.slane %v1388_v24, 1  ;;  %v153_v51 = vperm.slane %v1388_v24, 2 }
   0x9   :  { %85 = vmatpush.msra.mxu1 %v44_v5 }
   0xa   :  { %1128 = vmatmul.msk.f32.vlgmr.msra.gmra.mxu1 %vm63_vm0, %v30_v7 }
   0xc   :  { %1192 = vrot.lane.b32.xlu0 %v1364_v8, %s1289_s9  ;;  %1202 = vrot.lane.b32.xlu1 %v1364_v8, %s1290_s10  ;;  %s1292_s9 = smov 112  }
  0x12   :  { %1129 = vmatmul.msk.f32.gmra.mxu1 %vm63_vm0, %v31_v11 }
  0x76   :  { %v1188_v12 = vpop.permute.xlu0 %1187  ;;  %v1198_v15 = vpop.permute.xlu1 %1197 }
  0x77   :  { %v1189_v13 = vunpack.i.l.bf16 %v1188_v12  ;;  %v1190_v14 = vunpack.i.h.bf16 %v1188_v12  ;;  %v1199_v18 = vunpack.i.l.bf16 %v1198_v15  ;;  %v1200_v19 = vunpack.i.h.bf16 %v1198_v15 }
  0x79   :  { %136 = vmatpush.msrb.mxu1 %v1189_v13  ;;  %190 = vmatpush.msra.mxu2 %v1199_v18 }
  0x7b   :  { %137 = vmatpush.msrb.mxu1 %v1190_v14  ;;  %191 = vmatpush.msra.mxu2 %v1200_v19 }
  0x7e   :  { %v1193_v20 = vpop.permute.xlu0 %1192  ;;  %v1203_v25 = vpop.permute.xlu1 %1202 }
  0x7f   :  { %v1194_v21 = vunpack.i.l.bf16 %v1193_v20  ;;  %v1195_v23 = vunpack.i.h.bf16 %v1193_v20  ;;  %v1204_v29 = vunpack.i.l.bf16 %v1203_v25  ;;  %v1205_v30 = vunpack.i.h.bf16 %v1203_v25 }
  0x81   :  { %138 = vmatpush.msrb.mxu1 %v1194_v21  ;;  %192 = vmatpush.msra.mxu2 %v1204_v29 }
  0x83   :  { %139 = vmatpush.msrb.mxu1 %v1195_v23  ;;  %193 = vmatpush.msra.mxu2 %v1205_v30 }
  0x84   :  { %1130 = vmatmul.msk.f32.vlgmr.msrb.gmra.mxu1 %vm63_vm0, %v40_v22  ;;  %1134 = vmatmul.msk.f32.vlgmr.msra.gmra.mxu2 %vm63_vm0, %v32_v16 }
  0x87   :  { %v87_v31 = vpop.f32.mrf.mxu1 }
  0x88   :  { %v88_v33 = vadd.f32 %v87_v31, %v62_v26 }
  0x8a   :  { %v1399_v34 = vmul.f32 0.35355338, %v88_v33 }
  0x8c   :  { %1131 = vmatmul.msk.f32.gmra.mxu1 %vm63_vm0, %v41_v32  ;;  %361 = vrot.lane.b32.xlu0 %v1399_v34, %s1291_s27 }
  0x8d   :  { %1135 = vmatmul.msk.f32.gmra.mxu2 %vm63_vm0, %v33_v27 }
  0x8f   :  { %v90_v41 = vpop.f32.mrf.mxu1 }
  0x90   :  { %v91_v42 = vadd.f32 %v90_v41, %v62_v26 }
  0x92   :  { %v1423_v43 = vmul.f32 0.35355338, %v91_v42 }
  0x94   :  { %1132 = vmatmul.msk.f32.gmra.mxu1 %vm63_vm0, %v42_v37  ;;  %535 = vrot.lane.b32.xlu0 %v1399_v34, %s1292_s9 }
  0x95   :  { %1136 = vmatmul.msk.f32.gmra.mxu2 %vm63_vm0, %v34_v35  ;;  %393 = vrot.lane.b32.xlu1 %v1423_v43, %s1291_s27 }
  0x9c   :  { %1133 = vmatmul.msk.f32.gmra.mxu1 %vm63_vm0, %v43_v40 }
  0x9d   :  { %1137 = vmatmul.msk.f32.gmra.mxu2 %vm63_vm0, %v35_v38 }
  0xfe   :  { %v362_v21 = vpop.permute.xlu0 %361 }
 0x101   :  { %v141_v44 = vpop.f32.mrf.mxu1 }
 0x102   :  { %v142_v49 = vadd.f32 %v141_v44, %v95_v45 }
 0x106   :  { %v536_v26 = vpop.permute.xlu0 %535 }
 0x107   :  { %v195_v48 = vpop.f32.mrf.mxu2  ;;  %v394_v22 = vpop.permute.xlu1 %393 }
 0x108   :  { %v1435_v53 = vadd.f32 %v195_v48, %v153_v51 }
 0x109   :  { %v144_v46 = vpop.f32.mrf.mxu1 }
 0x10a   :  { %v145_v47 = vadd.f32 %v144_v46, %v95_v45 }
 0x10c   :  { %365 = vrot.lane.b32.xlu2 %v145_v47, %s1291_s27  ;;  %1138 = vmatpush.xpose.msk.msra.mxu3 %vm207_vm1, %v145_v47 }
 0x10d   :  { %709 = vrot.lane.b32.xlu1 %v145_v47, %s1293_s1 }
 0x110   :  { %1139 = vmatpush.xpose.msk.msra.mxu3 %vm207_vm1, %v142_v49  ;;  %v198_v52 = vpop.f32.mrf.mxu2 }
 0x111   :  { %v147_v50 = vpop.f32.mrf.mxu1  ;;  %v1437_v54 = vadd.f32 %v198_v52, %v153_v51 }
 0x112   :  { %v148_v57 = vadd.f32 %v147_v50, %v95_v45 }
 0x113   :  { %1140 = vmatmul.msk.f32.vlgmr.msra.gmra.mxu3 %vm207_vm1, %v1399_v34  ;;  %332 = vmatpush.msra.mxu0 %v1437_v54 }
 0x115   :  { %333 = vmatpush.msra.mxu0 %v1435_v53 }
 0x118   :  { %v201_v63 = vpop.f32.mrf.mxu2 }
 0x119   :  { %v150_v55 = vpop.f32.mrf.mxu1  ;;  %v1456_v1 = vadd.f32 %v201_v63, %v153_v51 }
 0x11a   :  { %v151_v56 = vadd.f32 %v150_v55, %v95_v45 }
 0x11c   :  { %1141 = vmatpush.xpose.msk.msrb.mxu3 %vm207_vm1, %v151_v56 }
 0x120   :  { %1142 = vmatpush.xpose.msk.msrb.mxu3 %vm207_vm1, %v148_v57  ;;  %v204_v0 = vpop.f32.mrf.mxu2 }
 0x121   :  { %v1458_v4 = vadd.f32 %v204_v0, %v153_v51 }
 0x123   :  { %1143 = vmatmul.msk.f32.vlgmr.msrb.gmra.mxu3 %vm207_vm1, %v1423_v43 }
 0x124   :  { %355 = vmatpush.msra.mxu3 %v1458_v4 }
 0x126   :  { %356 = vmatpush.msra.mxu3 %v1456_v1 }
 0x166   :  { %v366_v58 = vpop.permute.xlu2 %365 }
 0x167   :  { %1146 = vmatpush.xpose.msk.msrb.mxu0 %vm207_vm1, %v366_v58 }
 0x17f   :  { %v710_v25 = vpop.permute.xlu1 %709 }
 0x196   :  { %v234_v59 = vpop.f32.mrf.mxu3 }
 0x197   :  { %v267_v60 = vsel %vm266_vm2, %v234_v59, -inf }
 0x198   :  { %268 = vmax.xlane.f32.xlu2 %v267_v60 }
 0x1a6   :  { %v263_v61 = vpop.f32.mrf.mxu3 }
 0x1a7   :  { %v270_v62 = vsel %vm266_vm2, %v263_v61, -inf }
 0x1a8   :  { %271 = vmax.xlane.f32.xlu2 %v270_v62 }
 0x1c0   :  { %397 = vrot.lane.b32.xlu2 %v151_v56, %s1291_s27 }
 0x1c8   :  { %363 = vrot.lane.b32.xlu2 %v142_v49, %s1291_s27 }
 0x1d0   :  { %395 = vrot.lane.b32.xlu2 %v148_v57, %s1291_s27 }
 0x1d8   :  { %539 = vrot.lane.b32.xlu2 %v145_v47, %s1292_s9 }
 0x1e0   :  { %537 = vrot.lane.b32.xlu2 %v142_v49, %s1292_s9 }
 0x1e8   :  { %571 = vrot.lane.b32.xlu2 %v151_v56, %s1292_s9 }
 0x1f0   :  { %707 = vrot.lane.b32.xlu2 %v142_v49, %s1293_s1 }
 0x1f8   :  { %741 = vrot.lane.b32.xlu2 %v151_v56, %s1293_s1 }
 0x20b   :  { %v269_v5 = vpop.xlane.xlu2 %268 }
 0x20c   :  { %v273_v6 = vsub.f32 %v234_v59, %v269_v5 }
 0x20e   :  { %v275_v7 = vmul.f32 1.442695, %v273_v6 }
 0x210   :  { %1246 = vpow2.f32 %v275_v7 }
 0x216   :  { %v1247_v10 = vpop.eup %1246 }
 0x217   :  { %v279_v11 = vsel %vm266_vm2, %v1247_v10, 0.0 }
 0x218   :  { %280 = vadd.xlane.f32.xlu0 %v279_v11 }
 0x21b   :  { %v272_v12 = vpop.xlane.xlu2 %271 }
 0x21c   :  { %v274_v13 = vsub.f32 %v263_v61, %v272_v12 }
 0x21e   :  { %v277_v14 = vmul.f32 1.442695, %v274_v13 }
 0x220   :  { %1248 = vpow2.f32 %v277_v14 }
 0x223   :  { %v398_v15 = vpop.permute.xlu2 %397 }
 0x224   :  { %1149 = vmatpush.xpose.msk.msrb.mxu3 %vm207_vm1, %v398_v15 }
 0x226   :  { %v1464_v16 = vpop.eup %1248 }
 0x227   :  { %v282_v17 = vsel %vm266_vm2, %v1464_v16, 0.0 }
 0x228   :  { %283 = vadd.xlane.f32.xlu1 %v282_v17 }
 0x22b   :  { %v364_v18 = vpop.permute.xlu2 %363 }
 0x22c   :  { %569 = vrot.lane.b32.xlu0 %v148_v57, %s1292_s9  ;;  %1147 = vmatpush.xpose.msk.msrb.mxu0 %vm207_vm1, %v364_v18 }
 0x233   :  { %v396_v19 = vpop.permute.xlu2 %395 }
 0x234   :  { %705 = vrot.lane.b32.xlu0 %v1399_v34, %s1293_s1  ;;  %1150 = vmatpush.xpose.msk.msrb.mxu3 %vm207_vm1, %v396_v19 }
 0x23b   :  { %v540_v20 = vpop.permute.xlu2 %539 }
 0x23c   :  { %737 = vrot.lane.b32.xlu0 %v1423_v43, %s1293_s1  ;;  %1154 = vmatpush.xpose.msk.msrb.mxu2 %vm207_vm1, %v540_v20 }
 0x241   :  { %567 = vrot.lane.b32.xlu1 %v1423_v43, %s1292_s9 }
 0x243   :  { %v538_v23 = vpop.permute.xlu2 %537 }
 0x244   :  { %1155 = vmatpush.xpose.msk.msrb.mxu2 %vm207_vm1, %v538_v23  ;;  %v1206_v23 = vpack.i.bf16 %v1435_v53, %v1437_v54 }
 0x247   :  { %1156 = vmatmul.msk.f32.vlgmr.msrb.gmra.mxu2 %vm207_vm1, %v536_v26 }
 0x248   :  { %1162 = vmatpush.xpose.msk.msra.mxu2 %vm207_vm1, %v710_v25 }
 0x249   :  { %739 = vrot.lane.b32.xlu1 %v148_v57, %s1293_s1 }
 0x24b   :  { %v572_v27 = vpop.permute.xlu2 %571 }
 0x253   :  { %v708_v28 = vpop.permute.xlu2 %707 }
 0x254   :  { %1163 = vmatpush.xpose.msk.msra.mxu2 %vm207_vm1, %v708_v28 }
 0x25b   :  { %v742_v58 = vpop.permute.xlu2 %741 }
 0x28b   :  { %v281_v29 = vpop.xlane.xlu0 %280 }
 0x28c   :  { %1250 = vrcp.f32 %v281_v29  ;;  %v296_v34 = vand.u32 2147483648, %v281_v29  ;;  %v294_v35 = vand.u32 2147483647, %v281_v29  ;;  %vm290_vm4 = vweird.f32 %v281_v29 }
 0x28e   :  { %v297_v37 = vor.u32 1.1754944e-38, %v296_v34  ;;  %vm295_vm6 = vcmp.eq.f32.partialorder %v294_v35, 8.507059e+37 }
 0x292   :  { %v1251_v30 = vpop.eup %1250 }
 0x293   :  { %v286_v31 = vmul.f32 %v1251_v30, %v281_v29  ;;  %vm291_vm3 = vweird.f32 %v1251_v30 }
 0x294   :  { %vm292_vm5 = vmor %vm290_vm4, %vm291_vm3 }
 0x295   :  { %v287_v32 = vsub.f32 1.0, %v286_v31 }
 0x297   :  { %v288_v33 = vmul.f32 %v1251_v30, %v287_v32 }
 0x299   :  { %v289_v36 = vadd.f32 %v1251_v30, %v288_v33 }
 0x29b   :  { %v284_v38 = vpop.xlane.xlu1 %283  ;;  %v293_v39 = vsel %vm292_vm5, %v1251_v30, %v289_v36 }
 0x29c   :  { %1252 = vrcp.f32 %v284_v38  ;;  %v298_v40 = vsel %vm295_vm6, %v297_v37, %v293_v39  ;;  %v310_v46 = vand.u32 2147483648, %v284_v38  ;;  %v308_v49 = vand.u32 2147483647, %v284_v38 }
 0x29d   :  { %v313_v42 = vmul.f32 %v1247_v10, %v298_v40  ;;  %vm304_vm8 = vweird.f32 %v284_v38 }
 0x29e   :  { %v570_v41 = vpop.permute.xlu0 %569  ;;  %v311_v51 = vor.u32 1.1754944e-38, %v310_v46  ;;  %vm309_vm10 = vcmp.eq.f32.partialorder %v308_v49, 8.507059e+37 }
 0x29f   :  { %1144 = vmatmul.msk.f32.vlgmr.msra.gmra.mxu0 %vm266_vm2, %v313_v42 }
 0x2a2   :  { %v1253_v43 = vpop.eup %1252 }
 0x2a3   :  { %v300_v44 = vmul.f32 %v1253_v43, %v284_v38  ;;  %vm305_vm7 = vweird.f32 %v1253_v43 }
 0x2a4   :  { %vm306_vm9 = vmor %vm304_vm8, %vm305_vm7 }
 0x2a5   :  { %v301_v45 = vsub.f32 1.0, %v300_v44 }
 0x2a6   :  { %v706_v47 = vpop.permute.xlu0 %705 }
 0x2a7   :  { %v302_v48 = vmul.f32 %v1253_v43, %v301_v45  ;;  %1164 = vmatmul.msk.f32.vlgmr.msra.gmra.mxu2 %vm207_vm1, %v706_v47  ;;  %1148 = vmatmul.msk.f32.vlgmr.msrb.gmra.mxu0 %vm207_vm1, %v362_v21 }
 0x2a9   :  { %v303_v50 = vadd.f32 %v1253_v43, %v302_v48 }
 0x2ab   :  { %v307_v52 = vsel %vm306_vm9, %v1253_v43, %v303_v50 }
 0x2ac   :  { %v312_v55 = vsel %vm309_vm10, %v311_v51, %v307_v52 }
 0x2ad   :  { %v314_v56 = vmul.f32 %v1464_v16, %v312_v55 }
 0x2ae   :  { %v738_v60 = vpop.permute.xlu0 %737 }
 0x2af   :  { %1145 = vmatmul.msk.f32.vlgmr.msra.gmra.mxu3 %vm266_vm2, %v314_v56 }
 0x2b0   :  { %1157 = vmatpush.xpose.msk.msra.mxu3 %vm207_vm1, %v572_v27 }
 0x2b3   :  { %v568_v57 = vpop.permute.xlu1 %567 }
 0x2b4   :  { %1158 = vmatpush.xpose.msk.msra.mxu3 %vm207_vm1, %v570_v41 }
 0x2b7   :  { %1151 = vmatmul.msk.f32.vlgmr.msrb.gmra.mxu3 %vm207_vm1, %v394_v22  ;;  %v1211_v22 = vpack.i.bf16 %v1456_v1, %v1458_v4 }
 0x2b8   :  { %1165 = vmatpush.xpose.msk.msrb.mxu3 %vm207_vm1, %v742_v58 }
 0x2bb   :  { %v740_v59 = vpop.permute.xlu1 %739 }
 0x2bc   :  { %1166 = vmatpush.xpose.msk.msrb.mxu3 %vm207_vm1, %v740_v59 }
 0x2bf   :  { %1159 = vmatmul.msk.f32.vlgmr.msra.gmra.mxu3 %vm207_vm1, %v568_v57 }
 0x2c7   :  { %1167 = vmatmul.msk.f32.vlgmr.msrb.gmra.mxu3 %vm207_vm1, %v738_v60 }
 0x2ca   :  { %v564_v61 = vpop.f32.mrf.mxu2 }
 0x2cb   :  { %v599_v62 = vsel %vm266_vm2, %v564_v61, -inf }
 0x2cc   :  { %600 = vmax.xlane.f32.xlu0 %v599_v62 }
 0x31c   :  { %v1496_v63 = vpop.f32.mrf.mxu0 }
 0x324   :  { %v390_v0 = vpop.f32.mrf.mxu0 }
 0x325   :  { %v425_v5 = vsel %vm266_vm2, %v390_v0, -inf }
 0x326   :  { %426 = vmax.xlane.f32.xlu2 %v425_v5 }
 0x32a   :  { %v734_v6 = vpop.f32.mrf.mxu2 }
 0x32b   :  { %v769_v7 = vsel %vm266_vm2, %v734_v6, -inf }
 0x32c   :  { %770 = vmax.xlane.f32.xlu1 %v769_v7 }
 0x332   :  { %v1500_v10 = vpop.f32.mrf.mxu3 }
 0x33a   :  { %v422_v11 = vpop.f32.mrf.mxu3 }
 0x33b   :  { %v428_v12 = vsel %vm266_vm2, %v422_v11, -inf }
 0x33c   :  { %429 = vmax.xlane.f32.xlu1 %v428_v12 }
 0x33f   :  { %v601_v13 = vpop.xlane.xlu0 %600 }
 0x340   :  { %v605_v14 = vsub.f32 %v564_v61, %v601_v13 }
 0x342   :  { %v607_v15 = vmul.f32 1.442695, %v605_v14  ;;  %v596_v16 = vpop.f32.mrf.mxu3 }
 0x343   :  { %v602_v17 = vsel %vm266_vm2, %v596_v16, -inf }
 0x344   :  { %1254 = vpow2.f32 %v607_v15  ;;  %603 = vmax.xlane.f32.xlu2 %v602_v17 }
 0x34a   :  { %v1504_v18 = vpop.eup %1254  ;;  %v766_v20 = vpop.f32.mrf.mxu3 }
 0x34b   :  { %v611_v19 = vsel %vm266_vm2, %v1504_v18, 0.0  ;;  %v772_v21 = vsel %vm266_vm2, %v766_v20, -inf }
 0x34c   :  { %612 = vadd.xlane.f32.xlu0 %v611_v19 }
 0x354   :  { %773 = vmax.xlane.f32.xlu0 %v772_v21 }
 0x355   :  { %1212 = vrot.lane.b32.xlu1 %v1211_v22, %s1291_s27 }
 0x35c   :  { %1207 = vrot.lane.b32.xlu2 %v1206_v23, %s1291_s27 }
 0x399   :  { %v427_v25 = vpop.xlane.xlu2 %426 }
 0x39a   :  { %v431_v26 = vsub.f32 %v390_v0, %v427_v25 }
 0x39c   :  { %v433_v27 = vmul.f32 1.442695, %v431_v26 }
 0x39e   :  { %1256 = vpow2.f32 %v433_v27 }
 0x39f   :  { %v771_v28 = vpop.xlane.xlu1 %770 }
 0x3a0   :  { %v775_v29 = vsub.f32 %v734_v6, %v771_v28 }
 0x3a2   :  { %v777_v30 = vmul.f32 1.442695, %v775_v29 }
 0x3a4   :  { %1258 = vpow2.f32 %v777_v30  ;;  %v1515_v31 = vpop.eup %1256 }
 0x3a5   :  { %v437_v1 = vsel %vm266_vm2, %v1515_v31, 0.0 }
 0x3a6   :  { %438 = vadd.xlane.f32.xlu2 %v437_v1 }
 0x3aa   :  { %v1519_v4 = vpop.eup %1258 }
 0x3ab   :  { %v781_v53 = vsel %vm266_vm2, %v1519_v4, 0.0 }
 0x3ac   :  { %782 = vadd.xlane.f32.xlu0 %v781_v53 }
 0x3af   :  { %v430_v54 = vpop.xlane.xlu1 %429 }
 0x3b0   :  { %v432_v32 = vsub.f32 %v422_v11, %v430_v54 }
 0x3b2   :  { %v435_v33 = vmul.f32 1.442695, %v432_v32 }
 0x3b4   :  { %1260 = vpow2.f32 %v435_v33 }
 0x3b7   :  { %v604_v34 = vpop.xlane.xlu2 %603 }
 0x3b8   :  { %v606_v35 = vsub.f32 %v596_v16, %v604_v34 }
 0x3ba   :  { %v1523_v36 = vpop.eup %1260  ;;  %v609_v37 = vmul.f32 1.442695, %v606_v35 }
 0x3bb   :  { %v440_v38 = vsel %vm266_vm2, %v1523_v36, 0.0 }
 0x3bc   :  { %1262 = vpow2.f32 %v609_v37  ;;  %441 = vadd.xlane.f32.xlu1 %v440_v38 }
 0x3be   :  { %1222 = vrot.lane.b32.xlu2 %v1211_v22, %s1292_s9 }
 0x3bf   :  { %v1528_v39 = vpop.xlane.xlu0 %612  ;;  %v1208_v40 = vpop.permute.xlu2 %1207 }
 0x3c0   :  { %v1209_v41 = vunpack.i.l.bf16 %v1208_v40  ;;  %v1210_v43 = vunpack.i.h.bf16 %v1208_v40 }
 0x3c2   :  { %v1530_v42 = vpop.eup %1262  ;;  %498 = vmatpush.msra.mxu0 %v1209_v41 }
 0x3c3   :  { %v614_v44 = vsel %vm266_vm2, %v1530_v42, 0.0 }
 0x3c4   :  { %615 = vadd.xlane.f32.xlu1 %v614_v44  ;;  %499 = vmatpush.msra.mxu0 %v1210_v43 }
 0x3c6   :  { %1227 = vrot.lane.b32.xlu2 %v1206_v23, %s1293_s1 }
 0x3c7   :  { %v1213_v45 = vpop.permute.xlu1 %1212  ;;  %v774_v46 = vpop.xlane.xlu0 %773 }
 0x3c8   :  { %v1214_v47 = vunpack.i.l.bf16 %v1213_v45  ;;  %v776_v48 = vsub.f32 %v766_v20, %v774_v46  ;;  %v1215_v49 = vunpack.i.h.bf16 %v1213_v45 }
 0x3ca   :  { %v779_v50 = vmul.f32 1.442695, %v776_v48  ;;  %529 = vmatpush.msrb.mxu0 %v1214_v47 }
 0x3cc   :  { %1264 = vpow2.f32 %v779_v50  ;;  %530 = vmatpush.msrb.mxu0 %v1215_v49 }
 0x3ce   :  { %1237 = vrot.lane.b32.xlu2 %v1345_v2, %s1294_s3 }
 0x3d2   :  { %v1535_v51 = vpop.eup %1264 }
 0x3d3   :  { %v784_v52 = vsel %vm266_vm2, %v1535_v51, 0.0 }
 0x3d4   :  { %785 = vadd.xlane.f32.xlu0 %v784_v52 }
 0x3dd   :  { %1232 = vrot.lane.b32.xlu1 %v1211_v22, %s1293_s1 }
 0x3e5   :  { %1242 = vrot.lane.b32.xlu1 %v1364_v8, %s1294_s3 }
 0x3e8   :  { %1217 = vrot.lane.b32.xlu0 %v1206_v23, %s1292_s9 }
 0x419   :  { %v439_v55 = vpop.xlane.xlu2 %438 }
 0x41a   :  { %1266 = vrcp.f32 %v439_v55  ;;  %v454_v61 = vand.u32 2147483648, %v439_v55  ;;  %v452_v5 = vand.u32 2147483647, %v439_v55  ;;  %vm448_vm12 = vweird.f32 %v439_v55 }
 0x41c   :  { %v455_v7 = vor.u32 1.1754944e-38, %v454_v61  ;;  %vm453_vm14 = vcmp.eq.f32.partialorder %v452_v5, 8.507059e+37 }
 0x41f   :  { %v1544_v27 = vpop.xlane.xlu0 %782 }
 0x420   :  { %v1267_v56 = vpop.eup %1266 }
 0x421   :  { %v444_v57 = vmul.f32 %v1267_v56, %v439_v55  ;;  %v1223_v58 = vpop.permute.xlu2 %1222  ;;  %vm449_vm11 = vweird.f32 %v1267_v56 }
 0x422   :  { %v1224_v59 = vunpack.i.l.bf16 %v1223_v58  ;;  %v1225_v62 = vunpack.i.h.bf16 %v1223_v58  ;;  %vm450_vm13 = vmor %vm448_vm12, %vm449_vm11 }
 0x423   :  { %v445_v60 = vsub.f32 1.0, %v444_v57 }
 0x424   :  { %699 = vmatpush.msra.mxu1 %v1224_v59 }
 0x425   :  { %v446_v0 = vmul.f32 %v1267_v56, %v445_v60  ;;  %v628_v60 = vand.u32 2147483648, %v1528_v39 }
 0x426   :  { %700 = vmatpush.msra.mxu1 %v1225_v62  ;;  %v626_v62 = vand.u32 2147483647, %v1528_v39 }
 0x427   :  { %v447_v6 = vadd.f32 %v1267_v56, %v446_v0 }
 0x429   :  { %v451_v11 = vsel %vm450_vm13, %v1267_v56, %v447_v6  ;;  %vm622_vm13 = vweird.f32 %v1528_v39 }
 0x42a   :  { %v456_v12 = vsel %vm453_vm14, %v455_v7, %v451_v11 }
 0x42b   :  { %v471_v13 = vmul.f32 %v1515_v31, %v456_v12  ;;  %v629_v12 = vor.u32 1.1754944e-38, %v628_v60 }
 0x42d   :  { %1152 = vmatmul.msk.f32.vlgmr.msra.gmra.mxu0 %vm266_vm2, %v471_v13 }
 0x42f   :  { %v442_v14 = vpop.xlane.xlu1 %441 }
 0x430   :  { %1268 = vrcp.f32 %v442_v14  ;;  %v468_v20 = vand.u32 2147483648, %v442_v14  ;;  %v466_v22 = vand.u32 2147483647, %v442_v14  ;;  %vm462_vm3 = vweird.f32 %v442_v14 }
 0x432   :  { %v469_v26 = vor.u32 1.1754944e-38, %v468_v20  ;;  %vm467_vm5 = vcmp.eq.f32.partialorder %v466_v22, 8.507059e+37 }
 0x436   :  { %v1269_v15 = vpop.eup %1268 }
 0x437   :  { %v458_v16 = vmul.f32 %v1269_v15, %v442_v14  ;;  %v616_v17 = vpop.xlane.xlu1 %615  ;;  %vm463_vm15 = vweird.f32 %v1269_v15 }
 0x438   :  { %1270 = vrcp.f32 %v616_v17  ;;  %vm464_vm4 = vmor %vm462_vm3, %vm463_vm15  ;;  %v642_v53 = vand.u32 2147483648, %v616_v17  ;;  %v640_v32 = vand.u32 2147483647, %v616_v17  ;;  %vm636_vm7 = vweird.f32 %v616_v17 }
 0x439   :  { %v459_v19 = vsub.f32 1.0, %v458_v16  ;;  %1272 = vrcp.f32 %v1528_v39 }
 0x43a   :  { %v643_v35 = vor.u32 1.1754944e-38, %v642_v53  ;;  %1274 = vrcp.f32 %v1544_v27  ;;  %vm641_vm9 = vcmp.eq.f32.partialorder %v640_v32, 8.507059e+37 }
 0x43b   :  { %v460_v21 = vmul.f32 %v1269_v15, %v459_v19  ;;  %v798_v19 = vand.u32 2147483648, %v1544_v27 }
 0x43d   :  { %v461_v23 = vadd.f32 %v1269_v15, %v460_v21  ;;  %v796_v21 = vand.u32 2147483647, %v1544_v27 }
 0x43e   :  { %v1271_v25 = vpop.eup %1270 }
 0x43f   :  { %v465_v28 = vsel %vm464_vm4, %v1269_v15, %v461_v23  ;;  %v632_v29 = vmul.f32 %v1271_v25, %v616_v17  ;;  %vm637_vm6 = vweird.f32 %v1271_v25  ;;  %v1273_v33 = vpop.eup %1272  ;;  %vm627_vm4 = vcmp.eq.f32.partialorder %v626_v62, 8.507059e+37 }
 0x440   :  { %v470_v30 = vsel %vm467_vm5, %v469_v26, %v465_v28  ;;  %vm638_vm8 = vmor %vm636_vm7, %vm637_vm6  ;;  %v618_v40 = vmul.f32 %v1273_v33, %v1528_v39  ;;  %v1275_v44 = vpop.eup %1274  ;;  %vm623_vm11 = vweird.f32 %v1273_v33  ;;  %v1228_v39 = vpop.permute.xlu2 %1227  ;;  %vm792_vm6 = vweird.f32 %v1544_v27 }
 0x441   :  { %v633_v31 = vsub.f32 1.0, %v632_v29  ;;  %v472_v1 = vmul.f32 %v1523_v36, %v470_v30  ;;  %v788_v49 = vmul.f32 %v1275_v44, %v1544_v27  ;;  %vm624_vm15 = vmor %vm622_vm13, %vm623_vm11  ;;  %vm793_vm5 = vweird.f32 %v1275_v44 }
 0x442   :  { %v619_v43 = vsub.f32 1.0, %v618_v40  ;;  %vm794_vm7 = vmor %vm792_vm6, %vm793_vm5  ;;  %v1230_v26 = vunpack.i.h.bf16 %v1228_v39 }
 0x443   :  { %v634_v54 = vmul.f32 %v1271_v25, %v633_v31  ;;  %1153 = vmatmul.msk.f32.vlgmr.msrb.gmra.mxu0 %vm266_vm2, %v472_v1 }
 0x444   :  { %v620_v48 = vmul.f32 %v1273_v33, %v619_v43 }
 0x445   :  { %v635_v34 = vadd.f32 %v1271_v25, %v634_v54 }
 0x446   :  { %v621_v59 = vadd.f32 %v1273_v33, %v620_v48  ;;  %v906_v48 = vperm.slane %v1388_v24, 3 }
 0x447   :  { %v639_v37 = vsel %vm638_vm8, %v1271_v25, %v635_v34  ;;  %v786_v38 = vpop.xlane.xlu0 %785  ;;  %v799_v25 = vor.u32 1.1754944e-38, %v798_v19  ;;  %vm797_vm8 = vcmp.eq.f32.partialorder %v796_v21, 8.507059e+37  ;;  %v45_v19 = vld [vmem:[%s1654_s4 + $0x8] sm:$0xff] }
 0x448   :  { %v644_v41 = vsel %vm641_vm9, %v643_v35, %v639_v37  ;;  %1276 = vrcp.f32 %v786_v38  ;;  %v812_v55 = vand.u32 2147483648, %v786_v38  ;;  %v810_v58 = vand.u32 2147483647, %v786_v38  ;;  %v1238_v53 = vpop.permute.xlu2 %1237 }
 0x449   :  { %v646_v36 = vmul.f32 %v1530_v42, %v644_v41  ;;  %v789_v42 = vsub.f32 1.0, %v788_v49  ;;  %vm806_vm12 = vweird.f32 %v786_v38  ;;  %v625_v6 = vsel %vm624_vm15, %v1273_v33, %v621_v59 }
 0x44a   :  { %v813_v0 = vor.u32 1.1754944e-38, %v812_v55  ;;  %vm811_vm3 = vcmp.eq.f32.partialorder %v810_v58, 8.507059e+37  ;;  %v630_v15 = vsel %vm627_vm4, %v629_v12, %v625_v6  ;;  %v1240_v54 = vunpack.i.h.bf16 %v1238_v53 }
 0x44b   :  { %1161 = vmatmul.msk.f32.vlgmr.msra.gmra.mxu1 %vm266_vm2, %v646_v36  ;;  %v790_v7 = vmul.f32 %v1275_v44, %v789_v42  ;;  %v645_v22 = vmul.f32 %v1504_v18, %v630_v15  ;;  %v1239_v8 = vunpack.i.l.bf16 %v1238_v53  ;;  %vm903_vm9 = vcmask 195584  }
 0x44c   :  { %v1298_v58 = vmov 32.0   ;;  %vm1040_vm15 = vcmask 523264  }
 0x44d   :  { %v791_v17 = vadd.f32 %v1275_v44, %v790_v7  ;;  %937 = vmatpush.msrb.mxu2 %v1239_v8  ;;  %1278 = vrcp.f32 %v1298_v58 }
 0x44e   :  { %v1277_v45 = vpop.eup %1276 }
 0x44f   :  { %v802_v46 = vmul.f32 %v1277_v45, %v786_v38  ;;  %v1233_v47 = vpop.permute.xlu1 %1232  ;;  %vm807_vm10 = vweird.f32 %v1277_v45  ;;  %v795_v23 = vsel %vm794_vm7, %v1275_v44, %v791_v17  ;;  %938 = vmatpush.msrb.mxu2 %v1240_v54  ;;  %v49_v17 = vld [vmem:[%s1654_s4 + $0x28] sm:$0xff] }
 0x450   :  { %v1234_v50 = vunpack.i.l.bf16 %v1233_v47  ;;  %v1235_v56 = vunpack.i.h.bf16 %v1233_v47  ;;  %vm808_vm14 = vmor %vm806_vm12, %vm807_vm10  ;;  %v800_v28 = vsel %vm797_vm8, %v799_v25, %v795_v23  ;;  %v58_v23 = vld [vmem:[%s1660_s5 + $0x30] sm:$0xff]  ;;  %v57_v25 = vld [vmem:[%s1660_s5 + $0x28] sm:$0xff] }
 0x451   :  { %v803_v52 = vsub.f32 1.0, %v802_v46  ;;  %v815_v29 = vmul.f32 %v1519_v4, %v800_v28 }
 0x452   :  { %869 = vmatpush.msrb.mxu1 %v1234_v50 }
 0x453   :  { %v804_v57 = vmul.f32 %v1277_v45, %v803_v52  ;;  %v1279_v59 = vpop.eup %1278 }
 0x454   :  { %870 = vmatpush.msrb.mxu1 %v1235_v56  ;;  %v957_v42 = vmul.f32 32.0, %v1279_v59 }
 0x455   :  { %v805_v61 = vadd.f32 %v1277_v45, %v804_v57 }
 0x456   :  { %v958_v60 = vsub.f32 1.0, %v957_v42 }
 0x457   :  { %v809_v5 = vsel %vm808_vm14, %v1277_v45, %v805_v61  ;;  %v1243_v32 = vpop.permute.xlu1 %1242 }
 0x458   :  { %v814_v11 = vsel %vm811_vm3, %v813_v0, %v809_v5  ;;  %v1244_v2 = vunpack.i.l.bf16 %v1243_v32  ;;  %v1245_v33 = vunpack.i.h.bf16 %v1243_v32  ;;  %v959_v61 = vmul.f32 %v1279_v59, %v958_v60 }
 0x459   :  { %v816_v13 = vmul.f32 %v1535_v51, %v814_v11  ;;  %v1229_v51 = vunpack.i.l.bf16 %v1228_v39  ;;  %v47_v39 = vld [vmem:[%s1654_s4 + $0x18] sm:$0xff] }
 0x45a   :  { %v1218_v14 = vpop.permute.xlu0 %1217  ;;  %939 = vmatpush.msrb.mxu2 %v1244_v2  ;;  %v960_v62 = vadd.f32 %v1279_v59, %v959_v61  ;;  %v1001_v2 = vperm.slane %v1388_v24, 4 }
 0x45b   :  { %v1219_v16 = vunpack.i.l.bf16 %v1218_v14  ;;  %1169 = vmatmul.msk.f32.vlgmr.msrb.gmra.mxu1 %vm266_vm2, %v816_v13  ;;  %v1220_v20 = vunpack.i.h.bf16 %v1218_v14 }
 0x45c   :  { %940 = vmatpush.msrb.mxu2 %v1245_v33 }
 0x45d   :  { %670 = vmatpush.msra.mxu0 %v1219_v16  ;;  %v51_v16 = vld [vmem:[%s1654_s4 + $0x38] sm:$0xff] }
 0x45e   :  { %1026 = vmatpush.msra.mxu3 %v51_v16 }
 0x45f   :  { %671 = vmatpush.msra.mxu0 %v1220_v20 }
 0x460   :  { %1160 = vmatmul.msk.f32.vlgmr.msra.gmra.mxu0 %vm266_vm2, %v645_v22  ;;  %1027 = vmatpush.msra.mxu3 %v49_v17 }
 0x461   :  { %840 = vmatpush.msrb.mxu0 %v1229_v51  ;;  %v59_v51 = vld [vmem:[%s1660_s5 + $0x38] sm:$0xff] }
 0x462   :  { %1028 = vmatpush.msra.mxu3 %v47_v39 }
 0x463   :  { %841 = vmatpush.msrb.mxu0 %v1230_v26 }
 0x464   :  { %1029 = vmatpush.msra.mxu3 %v45_v19 }
 0x465   :  { %1055 = vmatpush.msra.mxu0 %v59_v51 }
 0x467   :  { %1056 = vmatpush.msra.mxu0 %v58_v23 }
 0x468   :  { %1168 = vmatmul.msk.f32.vlgmr.msrb.gmra.mxu0 %vm266_vm2, %v815_v29  ;;  %v56_v29 = vld [vmem:[%s1660_s5 + $0x20] sm:$0xff] }
 0x469   :  { %1057 = vmatpush.msra.mxu0 %v57_v25 }
 0x46b   :  { %1058 = vmatpush.msra.mxu0 %v56_v29 }
 0x4aa   :  { %v501_v18 = vpop.f32.mrf.mxu0 }
 0x4ab   :  { %877 = vrot.lane.b32.xlu0 %v501_v18, %s1295_s14 }
 0x4c0   :  { %v532_v27 = vpop.f32.mrf.mxu0 }
 0x4c1   :  { %879 = vrot.lane.b32.xlu1 %v532_v27, %s1295_s14 }
 0x4c8   :  { %v702_v31 = vpop.f32.mrf.mxu1 }
 0x4d8   :  { %v872_v4 = vpop.f32.mrf.mxu1 }
 0x4dd   :  { %v673_v30 = vpop.f32.mrf.mxu0 }
 0x4de   :  { %885 = vrot.lane.b32.xlu2 %v673_v30, %s1296_s15  ;;  %v55_v30 = vld [vmem:[%s1660_s5 + $0x18] sm:$0xff] }
 0x4df   :  { %1059 = vmatpush.msra.mxu0 %v55_v30 }
 0x4e5   :  { %v843_v1 = vpop.f32.mrf.mxu0 }
 0x4e6   :  { %887 = vrot.lane.b32.xlu2 %v702_v31, %s1296_s15  ;;  %893 = vrot.lane.b32.xlu0 %v843_v1, %s1297_s16 }
 0x4ee   :  { %895 = vrot.lane.b32.xlu0 %v872_v4, %s1297_s16 }
 0x51d   :  { %v878_v34 = vpop.permute.xlu0 %877 }
 0x51e   :  { %v899_v37 = vsel %vm207_vm1, %v1496_v63, %v878_v34 }
 0x533   :  { %v880_v36 = vpop.permute.xlu1 %879 }
 0x534   :  { %v900_v44 = vsel %vm207_vm1, %v1500_v10, %v880_v36  ;;  %vm961_vm1 = vweird.f32 %v1279_v59 }
 0x535   :  { %v1580_v0 = vsel %vm961_vm1, %v1279_v59, %v960_v62  ;;  %v1288_v59 = vld [vmem:[%s1659_s6] sm:$0xff] }
 0x536   :  { %v1039_v42 = vperm.slane %v1288_v59, 6 }
 0x538   :  { %v886_v35 = vpop.permute.xlu2 %885 }
 0x539   :  { %v901_v38 = vsel %vm266_vm2, %v899_v37, %v886_v35  ;;  %v1004_v37 = vperm.slane %v1388_v24, 5  ;;  %v54_v24 = vld [vmem:[%s1660_s5 + $0x10] sm:$0xff] }
 0x53a   :  { %1060 = vmatpush.msra.mxu0 %v54_v24 }
 0x540   :  { %v888_v43 = vpop.permute.xlu2 %887 }
 0x541   :  { %v902_v45 = vsel %vm266_vm2, %v900_v44, %v888_v43 }
 0x558   :  { %v894_v40 = vpop.permute.xlu0 %893 }
 0x559   :  { %v904_v41 = vsel %vm903_vm9, %v901_v38, %v894_v40 }
 0x55a   :  { %1170 = vmatmul.msk.f32.vlgmr.msrb.gmra.mxu2 %vm63_vm0, %v904_v41 }
 0x560   :  { %v896_v46 = vpop.permute.xlu0 %895 }
 0x561   :  { %v905_v47 = vsel %vm903_vm9, %v902_v45, %v896_v46 }
 0x562   :  { %1171 = vmatmul.msk.f32.gmra.mxu2 %vm63_vm0, %v905_v47 }
 0x5dd   :  { %v942_v63 = vpop.f32.mrf.mxu2 }
 0x5de   :  { %v943_v49 = vadd.f32 %v942_v63, %v906_v48  ;;  %v52_v63 = vld [vmem:[%s1660_s5] sm:$0xff] }
 0x5e0   :  { %v948_v50 = vadd.f32 %v943_v49, %v1350_v3  ;;  %v1631_v49 = vld [vmem:[%s1659_s6 + $0x8] sm:$0x3] }
 0x5e2   :  { %v950_v52 = vsel %vm63_vm0, %v948_v50, 0.0 }
 0x5e3   :  { %951 = vadd.xlane.f32.xlu1 %v950_v52 }
 0x5e5   :  { %v945_v55 = vpop.f32.mrf.mxu2 }
 0x5e6   :  { %v946_v56 = vadd.f32 %v945_v55, %v906_v48  ;;  %v53_v48 = vld [vmem:[%s1660_s5 + $0x8] sm:$0xff] }
 0x5e7   :  { %1061 = vmatpush.msra.mxu0 %v53_v48 }
 0x5e8   :  { %v949_v57 = vadd.f32 %v946_v56, %v1372_v9 }
 0x5e9   :  { %1062 = vmatpush.msra.mxu0 %v52_v63 }
 0x5ea   :  { %v953_v10 = vsel %vm63_vm0, %v949_v57, 0.0 }
 0x5eb   :  { %954 = vadd.xlane.f32.xlu2 %v953_v10 }
 0x656   :  { %v952_v3 = vpop.xlane.xlu1 %951 }
 0x657   :  { %v963_v5 = vmul.f32 %v1580_v0, %v952_v3 }
 0x659   :  { %v965_v6 = vsub.f32 %v948_v50, %v963_v5  ;;  %v1007_v50 = vperm.slane %v1631_v49, 1 }
 0x65b   :  { %v967_v7 = vmul.f32 %v965_v6, %v965_v6 }
 0x65d   :  { %v969_v9 = vsel %vm63_vm0, %v967_v7, 0.0 }
 0x65e   :  { %970 = vadd.xlane.f32.xlu0 %v969_v9  ;;  %v955_v11 = vpop.xlane.xlu2 %954 }
 0x65f   :  { %v964_v12 = vmul.f32 %v1580_v0, %v955_v11 }
 0x661   :  { %v966_v13 = vsub.f32 %v949_v57, %v964_v12 }
 0x663   :  { %v968_v14 = vmul.f32 %v966_v13, %v966_v13 }
 0x665   :  { %v972_v15 = vsel %vm63_vm0, %v968_v14, 0.0 }
 0x666   :  { %973 = vadd.xlane.f32.xlu1 %v972_v15 }
 0x6d1   :  { %v971_v20 = vpop.xlane.xlu0 %970 }
 0x6d2   :  { %v975_v21 = vmul.f32 %v971_v20, %v1580_v0 }
 0x6d4   :  { %v977_v22 = vadd.f32 1e-05, %v975_v21 }
 0x6d6   :  { %1280 = vrsqrt.f32 %v977_v22  ;;  %vm985_vm10 = vweird.f32 %v977_v22 }
 0x6d9   :  { %v974_v26 = vpop.xlane.xlu1 %973 }
 0x6da   :  { %v976_v28 = vmul.f32 %v974_v26, %v1580_v0 }
 0x6dc   :  { %v1281_v18 = vpop.eup %1280  ;;  %v978_v27 = vadd.f32 1e-05, %v976_v28 }
 0x6dd   :  { %v980_v31 = vmul.f32 %v1281_v18, %v977_v22  ;;  %vm986_vm2 = vweird.f32 %v1281_v18 }
 0x6de   :  { %1282 = vrsqrt.f32 %v978_v27  ;;  %vm987_vm11 = vmor %vm985_vm10, %vm986_vm2  ;;  %vm995_vm13 = vweird.f32 %v978_v27 }
 0x6df   :  { %v981_v1 = vmul.f32 %v1281_v18, %v980_v31 }
 0x6e1   :  { %v982_v4 = vmul.f32 0.5, %v981_v1 }
 0x6e3   :  { %v983_v53 = vsub.f32 1.5, %v982_v4 }
 0x6e4   :  { %v1283_v54 = vpop.eup %1282 }
 0x6e5   :  { %v984_v8 = vmul.f32 %v1281_v18, %v983_v53  ;;  %v990_v32 = vmul.f32 %v1283_v54, %v978_v27  ;;  %vm996_vm12 = vweird.f32 %v1283_v54  ;;  %v1116_v53 = vperm.slane %v1288_v59, 7 }
 0x6e6   :  { %vm997_vm14 = vmor %vm995_vm13, %vm996_vm12 }
 0x6e7   :  { %v988_v33 = vsel %vm987_vm11, %v1281_v18, %v984_v8  ;;  %v991_v34 = vmul.f32 %v1283_v54, %v990_v32  ;;  %v1119_v32 = vperm.slane %v1631_v49, 0 }
 0x6e8   :  { %v999_v35 = vmul.f32 %v988_v33, %v965_v6 }
 0x6e9   :  { %v992_v38 = vmul.f32 0.5, %v991_v34 }
 0x6ea   :  { %v1002_v40 = vmul.f32 %v1001_v2, %v999_v35 }
 0x6eb   :  { %v993_v41 = vsub.f32 1.5, %v992_v38 }
 0x6ec   :  { %v1005_v36 = vadd.f32 %v1004_v37, %v1002_v40 }
 0x6ed   :  { %v994_v43 = vmul.f32 %v1283_v54, %v993_v41 }
 0x6ee   :  { %1172 = vmatmul.msk.f32.vlgmr.msra.gmra.mxu3 %vm63_vm0, %v1005_v36 }
 0x6ef   :  { %v998_v44 = vsel %vm997_vm14, %v1283_v54, %v994_v43 }
 0x6f0   :  { %v1000_v45 = vmul.f32 %v998_v44, %v966_v13 }
 0x6f2   :  { %v1003_v46 = vmul.f32 %v1001_v2, %v1000_v45 }
 0x6f4   :  { %v1006_v47 = vadd.f32 %v1004_v37, %v1003_v46 }
 0x6f6   :  { %1173 = vmatmul.msk.f32.gmra.mxu3 %vm63_vm0, %v1006_v47 }
 0x771   :  { %v1031_v52 = vpop.f32.mrf.mxu3 }
 0x772   :  { %v1032_v55 = vadd.f32 %v1031_v52, %v1007_v50 }
 0x774   :  { %v1037_v56 = vmax.f32 %v1032_v55, 0.0 }
 0x776   :  { %1174 = vmatmul.msk.f32.vlgmr.msra.gmra.mxu0 %vm1040_vm15, %v1037_v56 }
 0x779   :  { %v1034_v57 = vpop.f32.mrf.mxu3 }
 0x77a   :  { %v1035_v10 = vadd.f32 %v1034_v57, %v1007_v50 }
 0x77c   :  { %v1038_v58 = vmax.f32 %v1035_v10, 0.0 }
 0x77e   :  { %1175 = vmatmul.msk.f32.gmra.mxu0 %vm1040_vm15, %v1038_v58 }
 0x7f3   :  { %v1064_v60 = vpop.f32.mrf.mxu0 }
 0x7f4   :  { %v1065_v61 = vadd.f32 %v1064_v60, %v1039_v42 }
 0x7f6   :  { %v1070_v62 = vadd.f32 %v1065_v61, %v1005_v36 }
 0x7f8   :  { %v1072_v3 = vsel %vm63_vm0, %v1070_v62, 0.0 }
 0x7f9   :  { %1073 = vadd.xlane.f32.xlu2 %v1072_v3 }
 0x7fb   :  { %v1067_v5 = vpop.f32.mrf.mxu0 }
 0x7fc   :  { %v1068_v6 = vadd.f32 %v1067_v5, %v1039_v42 }
 0x7fe   :  { %v1071_v7 = vadd.f32 %v1068_v6, %v1006_v47 }
 0x800   :  { %v1075_v9 = vsel %vm63_vm0, %v1071_v7, 0.0 }
 0x801   :  { %1076 = vadd.xlane.f32.xlu0 %v1075_v9 }
 0x86c   :  { %v1074_v11 = vpop.xlane.xlu2 %1073 }
 0x86d   :  { %v1078_v12 = vmul.f32 %v1074_v11, %v1580_v0 }
 0x86f   :  { %v1080_v13 = vsub.f32 %v1070_v62, %v1078_v12 }
 0x871   :  { %v1082_v14 = vmul.f32 %v1080_v13, %v1080_v13 }
 0x873   :  { %v1084_v15 = vsel %vm63_vm0, %v1082_v14, 0.0 }
 0x874   :  { %v1077_v16 = vpop.xlane.xlu0 %1076  ;;  %1085 = vadd.xlane.f32.xlu1 %v1084_v15 }
 0x875   :  { %v1079_v17 = vmul.f32 %v1077_v16, %v1580_v0 }
 0x877   :  { %v1081_v39 = vsub.f32 %v1071_v7, %v1079_v17 }
 0x879   :  { %v1083_v19 = vmul.f32 %v1081_v39, %v1081_v39 }
 0x87b   :  { %v1087_v20 = vsel %vm63_vm0, %v1083_v19, 0.0 }
 0x87c   :  { %1088 = vadd.xlane.f32.xlu2 %v1087_v20 }
 0x8e7   :  { %v1086_v21 = vpop.xlane.xlu1 %1085 }
 0x8e8   :  { %v1090_v22 = vmul.f32 %v1086_v21, %v1580_v0 }
 0x8ea   :  { %v1092_v51 = vadd.f32 1e-05, %v1090_v22 }
 0x8ec   :  { %1284 = vrsqrt.f32 %v1092_v51  ;;  %vm1100_vm4 = vweird.f32 %v1092_v51 }
 0x8ef   :  { %v1089_v23 = vpop.xlane.xlu2 %1088 }
 0x8f0   :  { %v1091_v25 = vmul.f32 %v1089_v23, %v1580_v0 }
 0x8f2   :  { %v1285_v26 = vpop.eup %1284  ;;  %v1093_v28 = vadd.f32 1e-05, %v1091_v25 }
 0x8f3   :  { %v1095_v29 = vmul.f32 %v1285_v26, %v1092_v51  ;;  %vm1101_vm3 = vweird.f32 %v1285_v26 }
 0x8f4   :  { %1286 = vrsqrt.f32 %v1093_v28  ;;  %vm1102_vm5 = vmor %vm1100_vm4, %vm1101_vm3  ;;  %vm1110_vm7 = vweird.f32 %v1093_v28 }
 0x8f5   :  { %v1096_v18 = vmul.f32 %v1285_v26, %v1095_v29 }
 0x8f7   :  { %v1097_v27 = vmul.f32 0.5, %v1096_v18 }
 0x8f9   :  { %v1098_v30 = vsub.f32 1.5, %v1097_v27 }
 0x8fa   :  { %v1287_v31 = vpop.eup %1286 }
 0x8fb   :  { %v1099_v1 = vmul.f32 %v1285_v26, %v1098_v30  ;;  %v1105_v4 = vmul.f32 %v1287_v31, %v1093_v28  ;;  %vm1111_vm6 = vweird.f32 %v1287_v31 }
 0x8fc   :  { %vm1112_vm8 = vmor %vm1110_vm7, %vm1111_vm6 }
 0x8fd   :  { %v1103_v54 = vsel %vm1102_vm5, %v1285_v26, %v1099_v1  ;;  %v1106_v8 = vmul.f32 %v1287_v31, %v1105_v4 }
 0x8fe   :  { %v1114_v2 = vmul.f32 %v1103_v54, %v1080_v13 }
 0x8ff   :  { %v1107_v0 = vmul.f32 0.5, %v1106_v8 }
 0x900   :  { %v1117_v33 = vmul.f32 %v1116_v53, %v1114_v2 }
 0x901   :  { %v1108_v34 = vsub.f32 1.5, %v1107_v0 }
 0x902   :  { %v1120_v35 = vadd.f32 %v1119_v32, %v1117_v33 }
 0x903   :  { %v1109_v37 = vmul.f32 %v1287_v31, %v1108_v34 }
 0x904   :  { %1122 = vst.msk [vmem:[%s1661_s7] sm:$0xff] %vm63_vm0, %v1120_v35 }
 0x905   :  { %v1113_v38 = vsel %vm1112_vm8, %v1287_v31, %v1109_v37 }
 0x906   :  { %v1115_v40 = vmul.f32 %v1113_v38, %v1081_v39 }
 0x908   :  { %v1118_v41 = vmul.f32 %v1116_v53, %v1115_v40 }
 0x90a   :  { %v1121_v36 = vadd.f32 %v1119_v32, %v1118_v41 }
 0x90c   :  { %1123 = vst.msk [vmem:[%s1661_s7 + $0x8] sm:$0xff] %vm63_vm0, %v1121_v36 }

</bundles_post_ra>
